<compile_context>
chip_gen: v5e
topology: v5e:2x2
jax: 0.10.0
libtpu: 0.0.40
codegen_flags: <defaults>
</compile_context>

<pallas_src>
import functools

import jax
import jax.numpy as jnp
from jax import lax
from jax.experimental import pallas as pl
from jax.experimental.pallas import tpu as pltpu

# ---------------------------------------------------------------------------
# Module configuration (deterministic, set in-script)
# ---------------------------------------------------------------------------
PROB = 0.7          # self.prob
N_MAX = 3           # self.n  (at most n-1 transforms actually applied)
NUM_TRANSFORMS = 4  # len(self.transforms)

# Deterministic transform parameters.
BRIGHT_SCALE = 1.25
OFFSET = 0.1
CONTRAST = 1.5

_SUBLANE = 8
_LANE = 128
_TM_MAX = 128     # rows per tile
_TN_MAX = 2048    # lanes per tile  -> <=1 MiB f32 per tile, 4 MiB dbl-buffered


# ---------------------------------------------------------------------------
# Pallas kernel: a single fused affine map  y = a*x + b  per tile.
# coef_ref is a tiny SMEM array [a, b]; x/o are VMEM tiles.
# ---------------------------------------------------------------------------
def affine_kernel(coef_ref, x_ref, o_ref):
    a = coef_ref[0]
    b = coef_ref[1]
    o_ref[...] = (x_ref[...].astype(jnp.float32) * a + b).astype(o_ref.dtype)


def _pick_block(dim, align, max_block):
    """Largest block <= max_block that is an `align`-multiple dividing `dim`,
    falling back to the full extent when no such block exists."""
    if dim <= max_block or dim % align != 0:
        return dim
    blk = (max_block // align) * align
    while blk > align and dim % blk != 0:
        blk -= align
    return blk if (blk >= align and dim % blk == 0) else dim


# ---------------------------------------------------------------------------
# Fold the selected transform chain (entries of idxs; -1 = no-op) into a single
# affine map.  The contrast op needs the *current* batch mean, which is tracked
# analytically: every candidate transform is affine, so the mean maps the same
# way the data does.
# ---------------------------------------------------------------------------
def _fold_affine(idxs, m0):
    def step(i, carry):
        a, b, m = carry
        t = idxs[i]
        # transform 0: brightness scale
        a0, b0, m0_ = a * BRIGHT_SCALE, b * BRIGHT_SCALE, m * BRIGHT_SCALE
        # transform 1: additive offset
        a1, b1, m1_ = a, b + OFFSET, m + OFFSET
        # transform 2: invert
        a2, b2, m2_ = -a, 1.0 - b, 1.0 - m
        # transform 3: contrast about current mean (mean is unchanged by it)
        a3, b3, m3_ = a * CONTRAST, CONTRAST * b + (1.0 - CONTRAST) * m, m

        def sel(v_id, v0, v1, v2, v3):
            v = v_id                       # t == -1 -> identity (padding slot)
            v = jnp.where(t == 0, v0, v)
            v = jnp.where(t == 1, v1, v)
            v = jnp.where(t == 2, v2, v)
            v = jnp.where(t == 3, v3, v)
            return v

        return (sel(a, a0, a1, a2, a3),
                sel(b, b0, b1, b2, b3),
                sel(m, m0_, m1_, m2_, m3_))

    a, b, _ = lax.fori_loop(
        0, N_MAX, step,
        (jnp.float32(1.0), jnp.float32(0.0), m0.astype(jnp.float32)))
    return a, b


@functools.partial(jax.jit)
def perform_at_most_n_kernel(x, idxs):
    """x: (N, C, H, W) float32, idxs: (N_MAX,) int32 with -1 padding."""
    N, C, H, W = x.shape
    M, Nl = N * C, H * W
    x2 = x.reshape(M, Nl)

    # Global batch mean once (cheap XLA reduction), then fold the whole
    # selected chain into y = a*x + b.
    m0 = jnp.mean(x2.astype(jnp.float32))
    a, b = _fold_affine(idxs, m0)
    coef = jnp.stack([a, b]).astype(jnp.float32)          # (2,) -> SMEM

    tm = _pick_block(M, _SUBLANE, _TM_MAX)
    tn = _pick_block(Nl, _LANE, _TN_MAX)
    grid = (M // tm, Nl // tn)

    out2 = pl.pallas_call(
        affine_kernel,
        out_shape=jax.ShapeDtypeStruct(x2.shape, x2.dtype),
        grid=grid,
        in_specs=[
            pl.BlockSpec(memory_space=pltpu.MemorySpace.SMEM),   # coef (2,)
            pl.BlockSpec((tm, tn), lambda i, j: (i, j)),         # x tile
        ],
        out_specs=pl.BlockSpec((tm, tn), lambda i, j: (i, j)),
        input_output_aliases={1: 0},                             # donate x2
        compiler_params=pltpu.CompilerParams(
            dimension_semantics=("parallel", "parallel")),
    )(coef, x2)
    return out2.reshape(N, C, H, W)


# ---------------------------------------------------------------------------
# Randomness matching the PyTorch forward:
#   if prob < rand(1): return batch
#   n_transforms = randperm(n)[0]
#   idxs = randperm(len(transforms))[:n_transforms]
# ---------------------------------------------------------------------------
def sample_transform_idxs(key, prob=PROB, n=N_MAX, num_transforms=NUM_TRANSFORMS):
    k_gate, k_count, k_perm = jax.random.split(key, 3)
    u = jax.random.uniform(k_gate, ())
    apply_any = prob >= u                                    # skip when prob < u
    n_transforms = jax.random.permutation(k_count, n)[0]     # uniform in [0, n-1]
    perm = jax.random.permutation(k_perm, num_transforms).astype(jnp.int32)
    slots = jnp.arange(n, dtype=jnp.int32)
    active = (slots < n_transforms) & apply_any
    idxs = jnp.where(active, perm[:n], jnp.int32(-1))
    return idxs


# Pure-JAX reference for correctness checking (same selected idxs),
# applying each transform sequentially and recomputing the mean like the
# PyTorch transform would.
def reference_apply(x, idxs_host):
    y = x.astype(jnp.float32)
    for t in idxs_host:
        t = int(t)
        if t == 0:
            y = y * BRIGHT_SCALE
        elif t == 1:
            y = y + OFFSET
        elif t == 2:
            y = 1.0 - y
        elif t == 3:
            m = jnp.mean(y)
            y = (y - m) * CONTRAST + m
    return y.astype(x.dtype)


if __name__ == "__main__":
    key = jax.random.PRNGKey(0)
    k_data, k_aug = jax.random.split(key)

    # Small NCHW batch consistent with an image-augmentation module.
    x = jax.random.uniform(k_data, (2, 4, 16, 16), dtype=jnp.float32)

    idxs = sample_transform_idxs(k_aug)
    idxs_host = jax.device_get(idxs)            # host-side, like torch's RNG calls
    idxs_dev = jnp.asarray(idxs_host, dtype=jnp.int32)

    out = perform_at_most_n_kernel(x, idxs_dev)
    out = jax.block_until_ready(out)

    ref = jax.block_until_ready(reference_apply(x, idxs_host))
    assert out.shape == x.shape and out.dtype == x.dtype
    assert jnp.allclose(out, ref, atol=1e-5, rtol=1e-5)

    print("KERNEL_OK")
</pallas_src>

<mosaic_0001>
module attributes {stable_mosaic.version = 11 : i64} {
  func.func @affine_kernel(%arg0: i32, %arg1: i32, %arg2: memref<2xf32, #tpu.memory_space<smem>>, %arg3: memref<8x256xf32, #tpu.memory_space<vmem>>, %arg4: memref<8x256xf32, #tpu.memory_space<vmem>>) attributes {dimension_semantics = [#tpu.dimension_semantics<parallel>, #tpu.dimension_semantics<parallel>], iteration_bounds = array<i64: 1, 1>, scalar_prefetch = 0 : i64, scratch_operands = 0 : i64, tpu.core_type = #tpu.core_type<tc>, window_params = [{transform_indices = @transform_0, window_bounds = array<i64: 2>}, {transform_indices = @transform_1, window_bounds = array<i64: 8, 256>}, {transform_indices = @transform_2, window_bounds = array<i64: 8, 256>}]} {
    %c0 = arith.constant 0 : index
    %0 = memref.load %arg2[%c0] : memref<2xf32, #tpu.memory_space<smem>>
    %c1 = arith.constant 1 : index
    %1 = memref.load %arg2[%c1] : memref<2xf32, #tpu.memory_space<smem>>
    %c0_0 = arith.constant 0 : index
    %c0_1 = arith.constant 0 : index
    %2 = vector.load %arg3[%c0_0, %c0_1] : memref<8x256xf32, #tpu.memory_space<vmem>>, vector<8x256xf32>
    %3 = vector.broadcast %0 : f32 to vector<8x256xf32>
    %4 = arith.mulf %2, %3 : vector<8x256xf32>
    %5 = vector.broadcast %1 : f32 to vector<8x256xf32>
    %6 = arith.addf %4, %5 : vector<8x256xf32>
    %c0_2 = arith.constant 0 : index
    %c0_3 = arith.constant 0 : index
    %7 = vector.load %arg4[%c0_2, %c0_3] : memref<8x256xf32, #tpu.memory_space<vmem>>, vector<8x256xf32>
    tpu.vector_store %arg4[%c0_2, %c0_3], %6 {strides = array<i32>} : memref<8x256xf32, #tpu.memory_space<vmem>>, vector<8x256xf32>,
    return
  }
  func.func @transform_0(%arg0: i32, %arg1: i32) -> i32 {
    %c0_i32 = arith.constant 0 : i32
    %c0_i32_0 = arith.constant 0 : i32
    return %c0_i32 : i32
  }
  func.func @transform_1(%arg0: i32, %arg1: i32) -> (i32, i32) {
    %c0_i32 = arith.constant 0 : i32
    return %arg0, %arg1 : i32, i32
  }
  func.func @transform_2(%arg0: i32, %arg1: i32) -> (i32, i32) {
    %c0_i32 = arith.constant 0 : i32
    return %arg0, %arg1 : i32, i32
  }
}

</mosaic_0001>

<bundles_post_ra>
// kernel: perform_at_most_n_kernel.1
= control target key start
LH: loop header
LB: loop body
LE: loop exit
PB: predicated region body
PF: predicated region fallthrough
CT: control target
= control target key end

     0   :  { %7 = vsyncpa [#allocation3], 0  ;;  %s57_s12 = smov [#allocation2]   ;;  %s88_s0 = inlined_call_operand.vmem [shape: f32[2], index: 0, kind: input, shape index: {}]   ;;  %s89_s1 = inlined_call_operand.vmem [shape: f32[8,256], index: 1, kind: input, shape index: {}, may-alias: {1,2}]   ;;  %s90_s2 = inlined_call_operand.vmem [shape: f32[8,256], index: 2, kind: output, shape index: {}, may-alias: {1,2}]  }
   0x1   :  { %s13_s11 = sshll.u32 %s88_s0, 4  ;;  %s14_s11 = int_to_ptr.vmem [resolvable:$true] %s13_s11 }
   0x2   :  { %16 = dma.vmem_to_smem %s14_s11, 16, %s57_s12, [#allocation3]  }
   0x3   :  { %55 = dma.done.wait [#allocation3], 16  }
   0x4   :  { %56 = vsyncadd [#allocation3], 4294967280 }
   0x5   :  { %23 = sfence }
   0x6   :  { %s24_s13 = sld [smem:[#allocation2]]  ;;  %v26_v0 = vld [vmem:[%s89_s1] sm:$0xff]  ;;  %v27_v1 = vld [vmem:[%s89_s1 + $0x8] sm:$0xff] }
   0x7   :  { %s41_s14 = sld [smem:[#allocation2 + $0x1]] }
   0xc   :  { %v28_v2 = vstv %s24_s13 }
   0xd   :  { %v29_v3 = vmul.f32 %v28_v2, %v26_v0  ;;  %v31_v4 = vstv %s41_s14  ;;  %v30_v5 = vmul.f32 %v28_v2, %v27_v1 }
   0xf   :  { %v32_v6 = vadd.f32 %v31_v4, %v29_v3  ;;  %v33_v7 = vadd.f32 %v31_v4, %v30_v5 }
  0x11   :  { %34 = vst [vmem:[%s90_s2] sm:$0xff] %v32_v6 }
  0x12   :  { %35 = vst [vmem:[%s90_s2 + $0x8] sm:$0xff] %v33_v7 }
  0x13   :  { %40 = vsyncpa [#allocation3], 1 }

</bundles_post_ra>
